<compile_context>
chip_gen: v5e
topology: v5e:2x2
jax: 0.10.0
libtpu: 0.0.40
codegen_flags: <defaults>
</compile_context>

<pallas_src>
import functools
import math

import jax
import jax.numpy as jnp
from jax import lax
from jax.experimental import pallas as pl
from jax.experimental.pallas import tpu as pltpu

_MASK_VALUE = -1e30


def _round_up(x, m):
    return ((x + m - 1) // m) * m


def _qkv_proj_kernel(x_ref, w_ref, qkv_ref):
    # x block: (1, tile, d_in_p); w: (d_in_p, 3*d_p); out: (1, tile, 3*d_p)
    qkv_ref[0] = jnp.dot(
        x_ref[0], w_ref[...], preferred_element_type=jnp.float32
    ).astype(qkv_ref.dtype)


def _flash_tile(q_ref, k_ref, v_ref, m_sc, l_sc, acc_sc, *, scale, apply_mask):
    """One (tq, tk) step of the online-softmax recurrence."""
    q = q_ref[0]                                             # (tq, d_p)
    q = q * jnp.asarray(scale, q.dtype)                      # fold 1/sqrt(d_k) into Q
    k = k_ref[0]                                             # (tk, d_p)
    v = v_ref[0]                                             # (tk, d_p)

    # Q @ K^T without materialising a transpose: contract the last dims.
    s = lax.dot_general(
        q, k,
        dimension_numbers=(((1,), (1,)), ((), ())),
        preferred_element_type=jnp.float32,
    )                                                        # (tq, tk)

    if apply_mask:  # only the diagonal tile needs the causal iota mask
        tq, tk = s.shape
        row = lax.broadcasted_iota(jnp.int32, (tq, tk), 0)
        col = lax.broadcasted_iota(jnp.int32, (tq, tk), 1)
        s = jnp.where(col > row, _MASK_VALUE, s)

    m_prev = m_sc[...]                                       # (tq, 1)
    m_new = jnp.maximum(m_prev, jnp.max(s, axis=-1, keepdims=True))
    alpha = jnp.exp(m_prev - m_new)
    p = jnp.exp(s - m_new)
    l_sc[...] = alpha * l_sc[...] + jnp.sum(p, axis=-1, keepdims=True)
    acc_sc[...] = alpha * acc_sc[...] + jnp.dot(
        p.astype(v.dtype), v, preferred_element_type=jnp.float32)
    m_sc[...] = m_new


def _flash_kernel(q_ref, k_ref, v_ref, o_ref, m_sc, l_sc, acc_sc, *, scale):
    qi = pl.program_id(1)
    ki = pl.program_id(2)

    @pl.when(ki == 0)
    def _init():
        m_sc[...] = jnp.full_like(m_sc, _MASK_VALUE)
        l_sc[...] = jnp.zeros_like(l_sc)
        acc_sc[...] = jnp.zeros_like(acc_sc)

    # Strictly below the diagonal: no masking needed at all.
    @pl.when(ki < qi)
    def _below_diag():
        _flash_tile(q_ref, k_ref, v_ref, m_sc, l_sc, acc_sc,
                    scale=scale, apply_mask=False)

    # Diagonal tile: apply the causal mask, then finalize this output tile.
    # Tiles with ki > qi are fully masked and skipped entirely.
    @pl.when(ki == qi)
    def _diag():
        _flash_tile(q_ref, k_ref, v_ref, m_sc, l_sc, acc_sc,
                    scale=scale, apply_mask=True)
        inv_l = pl.reciprocal(l_sc[...], approx=True)        # EUP, not VALU
        o_ref[0] = (acc_sc[...] * inv_l).astype(o_ref.dtype)


def causal_attention(x, w_query, w_key, w_value, *, tile=128):
    """x: [B, T, d_in]; w_*: [d_in, d_out].  Returns [B, T, d_out].

    Matches CausalAttention.forward in eval mode (dropout = identity).
    `tile` is the query/KV tile edge; 128 works on v5e/v6e/v7x (256 is a
    reasonable choice on v6e/v7x for long sequences).
    """
    b, t, d_in = x.shape
    d_out = w_query.shape[1]
    scale = 1.0 / math.sqrt(d_out)   # scale uses the TRUE d_out, as in PyTorch

    d_p = _round_up(d_out, 128)      # lane-dense head dim
    d_in_p = _round_up(d_in, 128)    # lane-dense input feature dim
    t_p = _round_up(t, tile)
    nt = t_p // tile

    # Zero-pad activations and pack/pad the three weights into one matrix.
    x_p = jnp.pad(x, ((0, 0), (0, t_p - t), (0, d_in_p - d_in)))
    w_qkv = jnp.zeros((d_in_p, 3 * d_p), x.dtype)
    w_qkv = w_qkv.at[:d_in, 0 * d_p:0 * d_p + d_out].set(w_query.astype(x.dtype))
    w_qkv = w_qkv.at[:d_in, 1 * d_p:1 * d_p + d_out].set(w_key.astype(x.dtype))
    w_qkv = w_qkv.at[:d_in, 2 * d_p:2 * d_p + d_out].set(w_value.astype(x.dtype))

    # ---- Kernel 1: fused QKV projection (one lane-dense matmul) ----
    qkv = pl.pallas_call(
        _qkv_proj_kernel,
        out_shape=jax.ShapeDtypeStruct((b, t_p, 3 * d_p), x.dtype),
        grid_spec=pltpu.PrefetchScalarGridSpec(
            num_scalar_prefetch=0,
            grid=(b, nt),
            in_specs=[
                pl.BlockSpec((1, tile, d_in_p), lambda bi, qi: (bi, qi, 0)),
                pl.BlockSpec((d_in_p, 3 * d_p), lambda bi, qi: (0, 0)),
            ],
            out_specs=pl.BlockSpec((1, tile, 3 * d_p),
                                   lambda bi, qi: (bi, qi, 0)),
        ),
        compiler_params=pltpu.CompilerParams(
            dimension_semantics=("parallel", "parallel")),
    )(x_p, w_qkv)

    # ---- Kernel 2: flash-style causal attention over (q-tile, kv-tile) ----
    out_p = pl.pallas_call(
        functools.partial(_flash_kernel, scale=scale),
        out_shape=jax.ShapeDtypeStruct((b, t_p, d_p), x.dtype),
        grid_spec=pltpu.PrefetchScalarGridSpec(
            num_scalar_prefetch=0,
            grid=(b, nt, nt),
            in_specs=[
                # Q, K, V are lane-aligned 128-wide slices of the same fused
                # qkv array (block index 0 / 1 / 2 along the last axis).
                pl.BlockSpec((1, tile, d_p), lambda bi, qi, ki: (bi, qi, 0)),
                pl.BlockSpec((1, tile, d_p), lambda bi, qi, ki: (bi, ki, 1)),
                pl.BlockSpec((1, tile, d_p), lambda bi, qi, ki: (bi, ki, 2)),
            ],
            out_specs=pl.BlockSpec((1, tile, d_p),
                                   lambda bi, qi, ki: (bi, qi, 0)),
            scratch_shapes=[
                pltpu.VMEM((tile, 1), jnp.float32),     # running max m
                pltpu.VMEM((tile, 1), jnp.float32),     # running denom l
                pltpu.VMEM((tile, d_p), jnp.float32),   # running numerator
            ],
        ),
        compiler_params=pltpu.CompilerParams(
            dimension_semantics=("parallel", "parallel", "arbitrary")),
    )(qkv, qkv, qkv)

    return out_p[:, :t, :d_out]


def _reference(x, wq, wk, wv):
    """Pure-JAX reference matching the PyTorch forward (eval mode)."""
    q = x @ wq
    k = x @ wk
    v = x @ wv
    scores = jnp.einsum("btd,bsd->bts", q, k)
    t = x.shape[1]
    mask = jnp.triu(jnp.ones((t, t), dtype=bool), k=1)
    scores = jnp.where(mask[None, :, :], -jnp.inf, scores)
    w = jax.nn.softmax(scores / math.sqrt(q.shape[-1]), axis=-1)
    return w @ v


if __name__ == "__main__":
    # Shapes consistent with the chapter: d_in=3, d_out=2, small seq & batch.
    B, T, D_IN, D_OUT = 2, 6, 3, 2

    key = jax.random.PRNGKey(0)
    kx, kq, kk, kv, kx2 = jax.random.split(key, 5)

    x = jax.random.uniform(kx, (B, T, D_IN), dtype=jnp.float32)
    bound = 1.0 / math.sqrt(D_IN)
    w_query = jax.random.uniform(kq, (D_IN, D_OUT), jnp.float32, -bound, bound)
    w_key = jax.random.uniform(kk, (D_IN, D_OUT), jnp.float32, -bound, bound)
    w_value = jax.random.uniform(kv, (D_IN, D_OUT), jnp.float32, -bound, bound)

    out = causal_attention(x, w_query, w_key, w_value)
    out = jax.block_until_ready(out)
    ref = _reference(x, w_query, w_key, w_value)
    assert out.shape == (B, T, D_OUT)
    assert jnp.allclose(out, ref, atol=2e-3, rtol=2e-3), "mismatch vs reference"

    # Second check exercising multiple q/kv tiles, padding and causal skip.
    T2 = 260
    x2 = jax.random.uniform(kx2, (B, T2, D_IN), dtype=jnp.float32)
    out2 = jax.block_until_ready(causal_attention(x2, w_query, w_key, w_value))
    ref2 = _reference(x2, w_query, w_key, w_value)
    assert out2.shape == (B, T2, D_OUT)
    assert jnp.allclose(out2, ref2, atol=2e-3, rtol=2e-3), "mismatch (tiled)"

    print("KERNEL_OK")
</pallas_src>

<mosaic_0001>
module attributes {stable_mosaic.version = 11 : i64} {
  func.func @_qkv_proj_kernel(%arg0: i32, %arg1: i32, %arg2: memref<1x128x128xf32, #tpu.memory_space<vmem>>, %arg3: memref<128x384xf32, #tpu.memory_space<vmem>>, %arg4: memref<1x128x384xf32, #tpu.memory_space<vmem>>) attributes {dimension_semantics = [#tpu.dimension_semantics<parallel>, #tpu.dimension_semantics<parallel>], iteration_bounds = array<i64: 2, 1>, scalar_prefetch = 0 : i64, scratch_operands = 0 : i64, tpu.core_type = #tpu.core_type<tc>, window_params = [{transform_indices = @transform_0, window_bounds = array<i64: 1, 128, 128>}, {pipeline_mode = #tpu.pipeline_mode<synchronous>, transform_indices = @transform_1, window_bounds = array<i64: 128, 384>}, {transform_indices = @transform_2, window_bounds = array<i64: 1, 128, 384>}]} {
    %c0 = arith.constant 0 : index
    %c0_0 = arith.constant 0 : index
    %c0_1 = arith.constant 0 : index
    %0 = vector.load %arg2[%c0, %c0_0, %c0_1] : memref<1x128x128xf32, #tpu.memory_space<vmem>>, vector<1x128x128xf32>
    %1 = vector.shape_cast %0 : vector<1x128x128xf32> to vector<128x128xf32>
    %c0_2 = arith.constant 0 : index
    %c0_3 = arith.constant 0 : index
    %2 = vector.load %arg3[%c0_2, %c0_3] : memref<128x384xf32, #tpu.memory_space<vmem>>, vector<128x384xf32>
    %cst = arith.constant dense<0.000000e+00> : vector<128x384xf32>
    %3 = tpu.matmul %1, %2, %cst {dimension_numbers = #tpu.dot_dimension_numbers<[1], [0], [0], [1], [0, 0, 1, 1], [], []>} : vector<128x128xf32>, vector<128x384xf32>, vector<128x384xf32> -> vector<128x384xf32>
    %c0_4 = arith.constant 0 : index
    %c0_5 = arith.constant 0 : index
    %c0_6 = arith.constant 0 : index
    %4 = vector.load %arg4[%c0_4, %c0_5, %c0_6] : memref<1x128x384xf32, #tpu.memory_space<vmem>>, vector<1x128x384xf32>
    %5 = vector.shape_cast %4 : vector<1x128x384xf32> to vector<128x384xf32>
    %6 = vector.shape_cast %3 : vector<128x384xf32> to vector<1x128x384xf32>
    tpu.vector_store %arg4[%c0_4, %c0_5, %c0_6], %6 {strides = array<i32>} : memref<1x128x384xf32, #tpu.memory_space<vmem>>, vector<1x128x384xf32>,
    return
  }
  func.func @transform_0(%arg0: i32, %arg1: i32) -> (i32, i32, i32) {
    %c0_i32 = arith.constant 0 : i32
    %c0_i32_0 = arith.constant 0 : i32
    return %arg0, %arg1, %c0_i32 : i32, i32, i32
  }
  func.func @transform_1(%arg0: i32, %arg1: i32) -> (i32, i32) {
    %c0_i32 = arith.constant 0 : i32
    %c0_i32_0 = arith.constant 0 : i32
    %c0_i32_1 = arith.constant 0 : i32
    return %c0_i32, %c0_i32_0 : i32, i32
  }
  func.func @transform_2(%arg0: i32, %arg1: i32) -> (i32, i32, i32) {
    %c0_i32 = arith.constant 0 : i32
    %c0_i32_0 = arith.constant 0 : i32
    return %arg0, %arg1, %c0_i32 : i32, i32, i32
  }
}

</mosaic_0001>

<bundles_post_ra>
// kernel: tpu_custom_call.1
= control target key start
LH: loop header
LB: loop body
LE: loop exit
PB: predicated region body
PF: predicated region fallthrough
CT: control target
= control target key end

     0   :  { %7 = vsyncpa [#allocation3], 0  ;;  %s1285_s0 = inlined_call_operand.hbm [shape: f32[2,128,128], index: 0, kind: input, shape index: {}]   ;;  %s1286_s1 = inlined_call_operand.hbm [shape: f32[128,384], index: 1, kind: input, shape index: {}]   ;;  %s1287_s2 = inlined_call_operand.hbm [shape: f32[2,128,384], index: 2, kind: output, shape index: {}]  }
   0x1   :  { %9 = vsyncpa [#allocation3 + $0x1], 0 }
   0x2   :  { %10 = vsyncpa [#allocation6], 0 }
   0x3   :  { %11 = vsyncpa [#allocation4], 0 }
   0x4   :  { %13 = vsyncpa [#allocation4 + $0x1], 0  ;;  %s938_s9 = smov 0   ;;  %s940_s10 = smov 0  }
   0x5   :  { %s942_s11 = smov 0   ;;  %s944_s12 = smov 0  }
   0x6   :  { %s946_s13 = smov 0   ;;  %s948_s14 = smov 0  }
   0x7 LB: > { %s624_s15 = sadd.s32 4294967295, %s914_s14   ;;  %s625_s16 = sadd.s32 4294967294, %s914_s14   ;;  %s914_s14 = sphi %s948_s14, %s19_s14   ;;  %s910_s13 = sphi %s946_s13, %s1299_s13   ;;  %s906_s12 = sphi %s944_s12, %s1298_s12   ;;  %s902_s11 = sphi %s942_s11, %s1297_s11   ;;  %s898_s10 = sphi %s940_s10, %s1296_s10   ;;  %s894_s9 = sphi %s938_s9, %s1295_s9  }
   0x8   : > { %p53_p0 = scmp.ne.s32.totalorder %s898_s10, %s894_s9  ;;  %p972_p1 = scmp.eq.s32.totalorder %s624_s15, 0 }
   0x9   : > { %p976_p2 = scmp.eq.s32.totalorder %s624_s15, 1  ;;  %p106_p3 = scmp.eq.s32.totalorder %s625_s16, 1 }
   0xa   : > { %p982_p4 = por %p972_p1, %p53_p0  ;;  %p626_p5 = scmp.ge.s32.totalorder %s914_s14, 1 }
   0xb   : > { %p987_p6 = por %p106_p3, %p53_p0  ;;  %p113_p7 = scmp.lt.s32.totalorder %s914_s14, 3 }
   0xc   : > { %s124_s23 = sshll.u32 %s1286_s1, 4  ;;  %s916_s25 = smov [#allocation5]   ;;  %s125_s23 = int_to_ptr.hbm [resolvable:$true] %s124_s23 }
   0xd   : > { %p995_p8 = pnand %p626_p5, %p113_p7  ;;  %s126_s26 = sshll.u32 %s916_s25, 4  ;;  %s127_s26 = int_to_ptr.vmem [resolvable:$true] %s126_s26 }
   0xe   : > { %p628_p11 = scmp.ge.s32.totalorder %s914_s14, 2  ;;  %s917_s27 = smov 384  }
   0xf   : > { %p697_p9 = pneg %p995_p8  ;;  %s918_s28 = smov 24  }
  0x10   : > { %s31_s29 = sadd.s32 1, %s910_s13  ;;  %s40_s30 = sadd.s32 1, %s902_s11 }
  0x11   : > { %p698_p10 = pnand %p697_p9, %p972_p1  ;;  %p33_p12 = scmp.ge.s32.totalorder %s31_s29, 2 }
  0x12   : > { %p47_p13 = scmp.ne.s32.totalorder %s902_s11, %s898_s10  ;;  %p48_p0 = scmp.eq.s32.totalorder %s914_s14, 0 }
  0x13   : > { %700 = dma.hbm_to_vmem [thread:$0]  (!%p698_p10), %s125_s23, 6144, %s127_s26, [#allocation6], %s917_s27, %s917_s27, %s918_s28  }
  0x14   : > { %s1301_s29 = smov (%p33_p12, %s31_s29), 0  ;;  %p1011_p3 = por %p48_p0, %p47_p13 }
  0x15   : > { %p1017_p5 = por %p976_p2, %p47_p13  ;;  %s35_s5 = ssub.s32 %s910_s13, %s1301_s29 }
  0x16   : > { %p710_p7 = scmp.lt.s32.totalorder %s914_s14, 2  ;;  %p38_p9 = scmp.eq.s32.totalorder %s35_s5, 0 }
  0x17   : > { %s140_s6 = sand.u32 1, %s902_s11   ;;  %s638_s15 = sshll.u32 %s910_s13, 7 }
  0x18   : > { %s629_s7 = sshll.u32 %s140_s6, 7  ;;  %s151_s22 = scalar_lea.hbm %s1285_s0, %s638_s15 }
  0x19   : > { %s1026_s8 = scalar_select %p38_p9, %s902_s11, %s40_s30  }
  0x1a   : > { %s144_s23 = scalar_lea.vmem [#allocation2], %s629_s7  ;;  %s152_s18 = sshll.u32 %s151_s22, 4  ;;  %s153_s18 = int_to_ptr.hbm [resolvable:$true] %s152_s18 }
  0x1b   : > { %s154_s25 = sshll.u32 %s144_s23, 4  ;;  %p702_p2 = pnand %p710_p7, %p1011_p3  ;;  %s155_s25 = int_to_ptr.vmem [resolvable:$true] %s154_s25 }
  0x1c   : > { %s141_s26 = scalar_lea.sflag [#allocation3], %s140_s6  ;;  %s919_s27 = smov 128  }
  0x1d   : > { %s920_s28 = smov 8   ;;  %166 = sbr.rel (%p995_p8) target bundleno = 294 (0x126), region = 28 }
  0x1e   : > { %704 = dma.hbm_to_vmem [thread:$0]  (!%p702_p2), %s153_s18, 2048, %s155_s25, %s141_s26, %s919_s27, %s919_s27, %s920_s28  }
  0x1f   : > { %s1037_s30 = sand.u32 (!%p995_p8), 1, %s898_s10  }
  0x20   : > { %s633_s5 = sshll.u32 (!%p995_p8), %s1037_s30, 7  ;;  %s169_s7 = scalar_lea.sflag (!%p995_p8), [#allocation3], %s1037_s30 }
  0x21   : > { %s1041_s15 = scalar_lea.vmem (!%p995_p8), [#allocation2], %s633_s5 }
  0x22   : > { %881 = dma.done.wait (%p982_p4), %s169_s7, 2048  }
  0x23   : > { %883 = vsyncadd (%p982_p4), %s169_s7, 4294965248 }
  0x24   : > { %885 = dma.done.wait (%p972_p1), [#allocation6], 6144  }
  0x25   : > { %887 = vsyncadd (%p972_p1), [#allocation6], 4294961152  ;;  %v262_v0 = vld [vmem:[#allocation5 + $0x168] sm:$0xff]  ;;  %v1051_v1 = vld [vmem:[#allocation5 + $0x178] sm:$0xff]  ;;  %s687_s17 = smul.u32 384, %s1037_s30  ;;  %s848_s27 = scalar_lea.hbm %s1287_s2, 768 }
  0x26   : > { %v259_v2 = vld [vmem:[#allocation5 + $0x150] sm:$0xff]  ;;  %639 = vmatpush.msra.mxu3 %v262_v0  ;;  %395 = vmatpush.msra.mxu2 %v1051_v1  ;;  %v1054_v3 = vld [vmem:[#allocation5 + $0x160] sm:$0xff]  ;;  %v256_v4 = vld [vmem:[#allocation5 + $0x138] sm:$0xff]  ;;  %s688_s24 = smul.u32 384, %s906_s12  ;;  %s509_s12 = scalar_lea.sflag [#allocation4], %s1037_s30 }
  0x27   : > { %v1056_v5 = vld [vmem:[#allocation5 + $0x148] sm:$0xff]  ;;  %265 = vmatpush.msra.mxu0 %v262_v0  ;;  %v1058_v6 = vld [vmem:[#allocation5 + $0x170] sm:$0xff]  ;;  %v1061_v7 = vld [vmem:[#allocation5 + $0x158] sm:$0xff]  ;;  %s1196_s19 = scalar_lea.vmem [#allocation7], %s687_s17 }
  0x28   : > { %640 = vmatpush.msra.mxu3 %v259_v2  ;;  %396 = vmatpush.msra.mxu2 %v1054_v3  ;;  %v253_v8 = vld [vmem:[#allocation5 + $0x120] sm:$0xff]  ;;  %v1064_v9 = vld [vmem:[#allocation5 + $0x130] sm:$0xff]  ;;  %v250_v11 = vld [vmem:[#allocation5 + $0x108] sm:$0xff]  ;;  %s523_s16 = scalar_lea.hbm %s1287_s2, %s688_s24  ;;  %s524_s21 = sshll.u32 %s1196_s19, 4  ;;  %s525_s21 = int_to_ptr.vmem [resolvable:$true] %s524_s21 }
  0x29   : > { %330 = vmatpush.msra.mxu1 %v1058_v6  ;;  %266 = vmatpush.msra.mxu0 %v259_v2  ;;  %v1067_v10 = vld [vmem:[#allocation5 + $0x140] sm:$0xff]  ;;  %v1070_v12 = vld [vmem:[#allocation5 + $0x118] sm:$0xff]  ;;  %v1073_v13 = vld [vmem:[#allocation5 + $0x128] sm:$0xff]  ;;  %s526_s22 = sshll.u32 %s523_s16, 4  ;;  %s527_s22 = int_to_ptr.hbm [resolvable:$true] %s526_s22 }
  0x2a   : > { %641 = vmatpush.msra.mxu3 %v256_v4  ;;  %397 = vmatpush.msra.mxu2 %v1056_v5  ;;  %v247_v14 = vld [vmem:[#allocation5 + $0xf0] sm:$0xff]  ;;  %v1076_v15 = vld [vmem:[#allocation5 + $0x100] sm:$0xff]  ;;  %v244_v17 = vld [vmem:[#allocation5 + $0xd8] sm:$0xff]  ;;  %s842_s23 = sshra.s32 %s527_s22, 4  ;;  %s843_s23 = int_to_ptr.hbm [resolvable:$true] %s842_s23 }
  0x2b   : > { %331 = vmatpush.msra.mxu1 %v1061_v7  ;;  %267 = vmatpush.msra.mxu0 %v256_v4  ;;  %v1079_v16 = vld [vmem:[#allocation5 + $0x110] sm:$0xff]  ;;  %v1082_v18 = vld [vmem:[#allocation5 + $0xe8] sm:$0xff]  ;;  %v1085_v19 = vld [vmem:[#allocation5 + $0xf8] sm:$0xff]  ;;  %s844_s25 = scalar_lea.hbm %s843_s23, 384  ;;  %p849_p10 = scmp.lt.s32.totalorder %s843_s23, %s1287_s2 }
  0x2c   : > { %642 = vmatpush.msra.mxu3 %v253_v8  ;;  %398 = vmatpush.msra.mxu2 %v1064_v9  ;;  %v241_v20 = vld [vmem:[#allocation5 + $0xc0] sm:$0xff]  ;;  %v1088_v21 = vld [vmem:[#allocation5 + $0xd0] sm:$0xff]  ;;  %v238_v23 = vld [vmem:[#allocation5 + $0xa8] sm:$0xff]  ;;  %p845_p1 = scmp.ne.s32.totalorder %s843_s23, %s844_s25  ;;  %p850_p12 = scmp.lt.s32.totalorder %s848_s27, %s844_s25 }
  0x2d   : > { %332 = vmatpush.msra.mxu1 %v1067_v10  ;;  %268 = vmatpush.msra.mxu0 %v253_v8  ;;  %v1091_v22 = vld [vmem:[#allocation5 + $0xe0] sm:$0xff]  ;;  %v1094_v24 = vld [vmem:[#allocation5 + $0xb8] sm:$0xff]  ;;  %v1097_v25 = vld [vmem:[#allocation5 + $0xc8] sm:$0xff] }
  0x2e   : > { %643 = vmatpush.msra.mxu3 %v250_v11  ;;  %399 = vmatpush.msra.mxu2 %v1070_v12  ;;  %v235_v26 = vld [vmem:[#allocation5 + $0x90] sm:$0xff]  ;;  %v1100_v27 = vld [vmem:[#allocation5 + $0xa0] sm:$0xff]  ;;  %v232_v29 = vld [vmem:[#allocation5 + $0x78] sm:$0xff]  ;;  %p846_p4 = pnand %p845_p1, %p1017_p5  ;;  %p851_p13 = por %p850_p12, %p849_p10 }
  0x2f   : > { %333 = vmatpush.msra.mxu1 %v1073_v13  ;;  %269 = vmatpush.msra.mxu0 %v250_v11  ;;  %v1103_v28 = vld [vmem:[#allocation5 + $0xb0] sm:$0xff]  ;;  %v1106_v30 = vld [vmem:[#allocation5 + $0x88] sm:$0xff]  ;;  %v1109_v31 = vld [vmem:[#allocation5 + $0x98] sm:$0xff] }
  0x30   : > { %644 = vmatpush.msra.mxu3 %v247_v14  ;;  %400 = vmatpush.msra.mxu2 %v1076_v15  ;;  %v229_v32 = vld [vmem:[#allocation5 + $0x60] sm:$0xff]  ;;  %v1112_v33 = vld [vmem:[#allocation5 + $0x70] sm:$0xff]  ;;  %v226_v35 = vld [vmem:[#allocation5 + $0x48] sm:$0xff]  ;;  %p847_p8 = pneg %p846_p4 }
  0x31   : > { %334 = vmatpush.msra.mxu1 %v1079_v16  ;;  %270 = vmatpush.msra.mxu0 %v247_v14  ;;  %v1115_v34 = vld [vmem:[#allocation5 + $0x80] sm:$0xff]  ;;  %v1118_v36 = vld [vmem:[#allocation5 + $0x58] sm:$0xff]  ;;  %v230_v37 = vld [vmem:[#allocation5 + $0x68] sm:$0xff] }
  0x32   : > { %645 = vmatpush.msra.mxu3 %v244_v17  ;;  %401 = vmatpush.msra.mxu2 %v1082_v18  ;;  %v223_v38 = vld [vmem:[#allocation5 + $0x30] sm:$0xff]  ;;  %v1122_v39 = vld [vmem:[#allocation5 + $0x40] sm:$0xff]  ;;  %v220_v41 = vld [vmem:[#allocation5 + $0x18] sm:$0xff]  ;;  %p852_p0 = pnand %p851_p13, %p847_p8 }
  0x33   : > { %335 = vmatpush.msra.mxu1 %v1085_v19  ;;  %271 = vmatpush.msra.mxu0 %v244_v17  ;;  %v227_v40 = vld [vmem:[#allocation5 + $0x50] sm:$0xff]  ;;  %v1125_v42 = vld [vmem:[#allocation5 + $0x28] sm:$0xff]  ;;  %v224_v43 = vld [vmem:[#allocation5 + $0x38] sm:$0xff] }
  0x34   : > { %646 = vmatpush.msra.mxu3 %v241_v20  ;;  %402 = vmatpush.msra.mxu2 %v1088_v21  ;;  %v217_v44 = vld [vmem:[#allocation5] sm:$0xff]  ;;  %v1128_v45 = vld [vmem:[#allocation5 + $0x10] sm:$0xff]  ;;  %v218_v49 = vld [vmem:[#allocation5 + $0x8] sm:$0xff] }
  0x35   : > { %336 = vmatpush.msra.mxu1 %v1091_v22  ;;  %272 = vmatpush.msra.mxu0 %v241_v20  ;;  %v1132_v46 = vld [vmem:[%s1041_s15 + $0x60] sm:$0xff]  ;;  %v1141_v50 = vld [vmem:[%s1041_s15 + $0x68] sm:$0xff]  ;;  %v1150_v52 = vld [vmem:[%s1041_s15 + $0x70] sm:$0xff] }
  0x36   : > { %647 = vmatpush.msra.mxu3 %v238_v23  ;;  %403 = vmatpush.msra.mxu2 %v1094_v24  ;;  %v201_v47 = vld [vmem:[%s1041_s15] sm:$0xff]  ;;  %v202_v51 = vld [vmem:[%s1041_s15 + $0x8] sm:$0xff]  ;;  %v203_v53 = vld [vmem:[%s1041_s15 + $0x10] sm:$0xff] }
  0x37   : > { %337 = vmatpush.msra.mxu1 %v1097_v25  ;;  %273 = vmatpush.msra.mxu0 %v238_v23  ;;  %v221_v48 = vld [vmem:[#allocation5 + $0x20] sm:$0xff]  ;;  %v1159_v54 = vld [vmem:[%s1041_s15 + $0x78] sm:$0xff]  ;;  %v206_v57 = vld [vmem:[%s1041_s15 + $0x28] sm:$0xff] }
  0x38   : > { %648 = vmatpush.msra.mxu3 %v235_v26  ;;  %404 = vmatpush.msra.mxu2 %v1100_v27  ;;  %v204_v55 = vld [vmem:[%s1041_s15 + $0x18] sm:$0xff]  ;;  %v205_v56 = vld [vmem:[%s1041_s15 + $0x20] sm:$0xff]  ;;  %v207_v58 = vld [vmem:[%s1041_s15 + $0x30] sm:$0xff] }
  0x39   : > { %338 = vmatpush.msra.mxu1 %v1103_v28  ;;  %274 = vmatpush.msra.mxu0 %v235_v26  ;;  %v208_v59 = vld [vmem:[%s1041_s15 + $0x38] sm:$0xff]  ;;  %v209_v60 = vld [vmem:[%s1041_s15 + $0x40] sm:$0xff]  ;;  %v210_v61 = vld [vmem:[%s1041_s15 + $0x48] sm:$0xff] }
  0x3a   : > { %649 = vmatpush.msra.mxu3 %v232_v29  ;;  %405 = vmatpush.msra.mxu2 %v1106_v30  ;;  %v211_v62 = vld [vmem:[%s1041_s15 + $0x50] sm:$0xff]  ;;  %v212_v63 = vld [vmem:[%s1041_s15 + $0x58] sm:$0xff] }
  0x3b   : > { %339 = vmatpush.msra.mxu1 %v1109_v31  ;;  %275 = vmatpush.msra.mxu0 %v232_v29 }
  0x3c   : > { %650 = vmatpush.msra.mxu3 %v229_v32  ;;  %406 = vmatpush.msra.mxu2 %v1112_v33 }
  0x3d   : > { %340 = vmatpush.msra.mxu1 %v1115_v34  ;;  %276 = vmatpush.msra.mxu0 %v229_v32 }
  0x3e   : > { %651 = vmatpush.msra.mxu3 %v226_v35  ;;  %407 = vmatpush.msra.mxu2 %v1118_v36 }
  0x3f   : > { %341 = vmatpush.msra.mxu1 %v230_v37  ;;  %277 = vmatpush.msra.mxu0 %v226_v35 }
  0x40   : > { %652 = vmatpush.msra.mxu3 %v223_v38  ;;  %408 = vmatpush.msra.mxu2 %v1122_v39 }
  0x41   : > { %342 = vmatpush.msra.mxu1 %v227_v40  ;;  %278 = vmatpush.msra.mxu0 %v223_v38 }
  0x42   : > { %653 = vmatpush.msra.mxu3 %v220_v41  ;;  %409 = vmatpush.msra.mxu2 %v1125_v42 }
  0x43   : > { %343 = vmatpush.msra.mxu1 %v224_v43  ;;  %279 = vmatpush.msra.mxu0 %v220_v41 }
  0x44   : > { %654 = vmatpush.msra.mxu3 %v217_v44  ;;  %410 = vmatpush.msra.mxu2 %v1128_v45 }
  0x45   : > { %317 = vmatmul.f32.vlgmr.msra.gmra.mxu3 %v1132_v46  ;;  %411 = vmatmul.f32.vlgmr.msra.gmra.mxu2 %v201_v47 }
  0x46   : > { %655 = vmatpush.msrb.mxu3 %v1058_v6  ;;  %344 = vmatpush.msra.mxu1 %v221_v48 }
  0x47   : > { %280 = vmatpush.msra.mxu0 %v217_v44 }
  0x48   : > { %656 = vmatpush.msrb.mxu3 %v1061_v7  ;;  %345 = vmatpush.msra.mxu1 %v218_v49 }
  0x49   : > { %281 = vmatmul.f32.vlgmr.msra.gmra.mxu0 %v201_v47  ;;  %346 = vmatmul.f32.vlgmr.msra.gmra.mxu1 %v201_v47 }
  0x4a   : > { %657 = vmatpush.msrb.mxu3 %v1067_v10 }
  0x4c   : > { %658 = vmatpush.msrb.mxu3 %v1073_v13 }
  0x4d   : > { %320 = vmatmul.f32.gmra.mxu3 %v1141_v50  ;;  %414 = vmatmul.f32.gmra.mxu2 %v202_v51 }
  0x4e   : > { %659 = vmatpush.msrb.mxu3 %v1079_v16 }
  0x50   : > { %660 = vmatpush.msrb.mxu3 %v1085_v19 }
  0x51   : > { %284 = vmatmul.f32.gmra.mxu0 %v202_v51  ;;  %349 = vmatmul.f32.gmra.mxu1 %v202_v51 }
  0x52   : > { %661 = vmatpush.msrb.mxu3 %v1091_v22 }
  0x54   : > { %662 = vmatpush.msrb.mxu3 %v1097_v25 }
  0x55   : > { %323 = vmatmul.f32.gmra.mxu3 %v1150_v52  ;;  %417 = vmatmul.f32.gmra.mxu2 %v203_v53 }
  0x56   : > { %663 = vmatpush.msrb.mxu3 %v1103_v28 }
  0x58   : > { %664 = vmatpush.msrb.mxu3 %v1109_v31 }
  0x59   : > { %287 = vmatmul.f32.gmra.mxu0 %v203_v53  ;;  %352 = vmatmul.f32.gmra.mxu1 %v203_v53 }
  0x5a   : > { %665 = vmatpush.msrb.mxu3 %v1115_v34 }
  0x5c   : > { %666 = vmatpush.msrb.mxu3 %v230_v37 }
  0x5d   : > { %326 = vmatmul.f32.gmra.mxu3 %v1159_v54  ;;  %420 = vmatmul.f32.gmra.mxu2 %v204_v55 }
  0x5e   : > { %667 = vmatpush.msrb.mxu3 %v227_v40 }
  0x60   : > { %668 = vmatpush.msrb.mxu3 %v224_v43 }
  0x61   : > { %290 = vmatmul.f32.gmra.mxu0 %v204_v55  ;;  %355 = vmatmul.f32.gmra.mxu1 %v204_v55 }
  0x62   : > { %669 = vmatpush.msrb.mxu3 %v221_v48 }
  0x64   : > { %670 = vmatpush.msrb.mxu3 %v218_v49 }
  0x65   : > { %382 = vmatmul.f32.vlgmr.msrb.gmra.mxu3 %v1132_v46  ;;  %423 = vmatmul.f32.gmra.mxu2 %v205_v56 }
  0x66   : > { %671 = vmatpush.msra.mxu3 %v1051_v1 }
  0x68   : > { %672 = vmatpush.msra.mxu3 %v1054_v3 }
  0x69   : > { %293 = vmatmul.f32.gmra.mxu0 %v205_v56  ;;  %358 = vmatmul.f32.gmra.mxu1 %v205_v56 }
  0x6a   : > { %673 = vmatpush.msra.mxu3 %v1056_v5 }
  0x6c   : > { %674 = vmatpush.msra.mxu3 %v1064_v9 }
  0x6d   : > { %385 = vmatmul.f32.gmra.mxu3 %v1141_v50  ;;  %426 = vmatmul.f32.gmra.mxu2 %v206_v57 }
  0x6e   : > { %675 = vmatpush.msra.mxu3 %v1070_v12 }
  0x70   : > { %676 = vmatpush.msra.mxu3 %v1076_v15 }
  0x71   : > { %296 = vmatmul.f32.gmra.mxu0 %v206_v57  ;;  %361 = vmatmul.f32.gmra.mxu1 %v206_v57 }
  0x72   : > { %677 = vmatpush.msra.mxu3 %v1082_v18 }
  0x74   : > { %678 = vmatpush.msra.mxu3 %v1088_v21 }
  0x75   : > { %388 = vmatmul.f32.gmra.mxu3 %v1150_v52  ;;  %429 = vmatmul.f32.gmra.mxu2 %v207_v58 }
  0x76   : > { %679 = vmatpush.msra.mxu3 %v1094_v24 }
  0x78   : > { %680 = vmatpush.msra.mxu3 %v1100_v27 }
  0x79   : > { %299 = vmatmul.f32.gmra.mxu0 %v207_v58  ;;  %364 = vmatmul.f32.gmra.mxu1 %v207_v58 }
  0x7a   : > { %681 = vmatpush.msra.mxu3 %v1106_v30 }
  0x7c   : > { %682 = vmatpush.msra.mxu3 %v1112_v33 }
  0x7d   : > { %391 = vmatmul.f32.gmra.mxu3 %v1159_v54  ;;  %432 = vmatmul.f32.gmra.mxu2 %v208_v59 }
  0x7e   : > { %683 = vmatpush.msra.mxu3 %v1118_v36 }
  0x80   : > { %684 = vmatpush.msra.mxu3 %v1122_v39 }
  0x81   : > { %302 = vmatmul.f32.gmra.mxu0 %v208_v59  ;;  %367 = vmatmul.f32.gmra.mxu1 %v208_v59 }
  0x82   : > { %685 = vmatpush.msra.mxu3 %v1125_v42 }
  0x84   : > { %686 = vmatpush.msra.mxu3 %v1128_v45 }
  0x85   : > { %435 = vmatmul.f32.gmra.mxu2 %v209_v60  ;;  %447 = vmatmul.f32.vlgmr.msra.gmra.mxu3 %v1132_v46 }
  0x89   : > { %305 = vmatmul.f32.gmra.mxu0 %v209_v60  ;;  %370 = vmatmul.f32.gmra.mxu1 %v209_v60 }
  0x8d   : > { %438 = vmatmul.f32.gmra.mxu2 %v210_v61  ;;  %450 = vmatmul.f32.gmra.mxu3 %v1141_v50 }
  0x91   : > { %308 = vmatmul.f32.gmra.mxu0 %v210_v61  ;;  %373 = vmatmul.f32.gmra.mxu1 %v210_v61 }
  0x95   : > { %441 = vmatmul.f32.gmra.mxu2 %v211_v62  ;;  %453 = vmatmul.f32.gmra.mxu3 %v1150_v52 }
  0x99   : > { %311 = vmatmul.f32.gmra.mxu0 %v211_v62  ;;  %376 = vmatmul.f32.gmra.mxu1 %v211_v62 }
  0x9d   : > { %444 = vmatmul.f32.gmra.mxu2 %v212_v63  ;;  %456 = vmatmul.f32.gmra.mxu3 %v1159_v54 }
  0xa1   : > { %314 = vmatmul.f32.gmra.mxu0 %v212_v63  ;;  %379 = vmatmul.f32.gmra.mxu1 %v212_v63 }
  0xc6   : > { %v282_v0 = vpop.f32.mrf.mxu0  ;;  %v347_v1 = vpop.f32.mrf.mxu1 }
  0xc7   : > { %460 = vst [vmem:[%s1196_s19] sm:$0xff] %v282_v0 }
  0xc8   : > { %v318_v2 = vpop.f32.mrf.mxu3  ;;  %461 = vst [vmem:[%s1196_s19 + $0x8] sm:$0xff] %v347_v1  ;;  %v412_v3 = vpop.f32.mrf.mxu2 }
  0xc9   : > { %496 = vst [vmem:[%s1196_s19 + $0x120] sm:$0xff] %v318_v2 }
  0xca   : > { %462 = vst [vmem:[%s1196_s19 + $0x10] sm:$0xff] %v412_v3 }
  0xce   : > { %v285_v4 = vpop.f32.mrf.mxu0  ;;  %v350_v5 = vpop.f32.mrf.mxu1 }
  0xcf   : > { %463 = vst [vmem:[%s1196_s19 + $0x18] sm:$0xff] %v285_v4 }
  0xd0   : > { %v321_v6 = vpop.f32.mrf.mxu3  ;;  %464 = vst [vmem:[%s1196_s19 + $0x20] sm:$0xff] %v350_v5  ;;  %v415_v7 = vpop.f32.mrf.mxu2 }
  0xd1   : > { %499 = vst [vmem:[%s1196_s19 + $0x138] sm:$0xff] %v321_v6 }
  0xd2   : > { %465 = vst [vmem:[%s1196_s19 + $0x28] sm:$0xff] %v415_v7 }
  0xd6   : > { %v288_v8 = vpop.f32.mrf.mxu0  ;;  %v353_v9 = vpop.f32.mrf.mxu1 }
  0xd7   : > { %466 = vst [vmem:[%s1196_s19 + $0x30] sm:$0xff] %v288_v8 }
  0xd8   : > { %v324_v10 = vpop.f32.mrf.mxu3  ;;  %467 = vst [vmem:[%s1196_s19 + $0x38] sm:$0xff] %v353_v9  ;;  %v418_v11 = vpop.f32.mrf.mxu2 }
  0xd9   : > { %502 = vst [vmem:[%s1196_s19 + $0x150] sm:$0xff] %v324_v10 }
  0xda   : > { %468 = vst [vmem:[%s1196_s19 + $0x40] sm:$0xff] %v418_v11 }
  0xde   : > { %v291_v12 = vpop.f32.mrf.mxu0  ;;  %v356_v13 = vpop.f32.mrf.mxu1 }
  0xdf   : > { %469 = vst [vmem:[%s1196_s19 + $0x48] sm:$0xff] %v291_v12 }
  0xe0   : > { %v327_v14 = vpop.f32.mrf.mxu3  ;;  %470 = vst [vmem:[%s1196_s19 + $0x50] sm:$0xff] %v356_v13  ;;  %v421_v15 = vpop.f32.mrf.mxu2 }
  0xe1   : > { %505 = vst [vmem:[%s1196_s19 + $0x168] sm:$0xff] %v327_v14 }
  0xe2   : > { %471 = vst [vmem:[%s1196_s19 + $0x58] sm:$0xff] %v421_v15 }
  0xe6   : > { %v294_v16 = vpop.f32.mrf.mxu0  ;;  %v359_v17 = vpop.f32.mrf.mxu1 }
  0xe7   : > { %472 = vst [vmem:[%s1196_s19 + $0x60] sm:$0xff] %v294_v16 }
  0xe8   : > { %473 = vst [vmem:[%s1196_s19 + $0x68] sm:$0xff] %v359_v17  ;;  %v383_v18 = vpop.f32.mrf.mxu3  ;;  %v424_v19 = vpop.f32.mrf.mxu2 }
  0xe9   : > { %497 = vst [vmem:[%s1196_s19 + $0x128] sm:$0xff] %v383_v18 }
  0xea   : > { %474 = vst [vmem:[%s1196_s19 + $0x70] sm:$0xff] %v424_v19 }
  0xee   : > { %v297_v20 = vpop.f32.mrf.mxu0  ;;  %v362_v21 = vpop.f32.mrf.mxu1 }
  0xef   : > { %475 = vst [vmem:[%s1196_s19 + $0x78] sm:$0xff] %v297_v20 }
  0xf0   : > { %476 = vst [vmem:[%s1196_s19 + $0x80] sm:$0xff] %v362_v21  ;;  %v386_v22 = vpop.f32.mrf.mxu3  ;;  %v427_v23 = vpop.f32.mrf.mxu2 }
  0xf1   : > { %500 = vst [vmem:[%s1196_s19 + $0x140] sm:$0xff] %v386_v22 }
  0xf2   : > { %477 = vst [vmem:[%s1196_s19 + $0x88] sm:$0xff] %v427_v23 }
  0xf6   : > { %v300_v24 = vpop.f32.mrf.mxu0  ;;  %v365_v25 = vpop.f32.mrf.mxu1 }
  0xf7   : > { %478 = vst [vmem:[%s1196_s19 + $0x90] sm:$0xff] %v300_v24 }
  0xf8   : > { %479 = vst [vmem:[%s1196_s19 + $0x98] sm:$0xff] %v365_v25  ;;  %v389_v26 = vpop.f32.mrf.mxu3  ;;  %v430_v27 = vpop.f32.mrf.mxu2 }
  0xf9   : > { %503 = vst [vmem:[%s1196_s19 + $0x158] sm:$0xff] %v389_v26 }
  0xfa   : > { %480 = vst [vmem:[%s1196_s19 + $0xa0] sm:$0xff] %v430_v27 }
  0xfe   : > { %v303_v28 = vpop.f32.mrf.mxu0  ;;  %v368_v29 = vpop.f32.mrf.mxu1 }
  0xff   : > { %481 = vst [vmem:[%s1196_s19 + $0xa8] sm:$0xff] %v303_v28 }
 0x100   : > { %482 = vst [vmem:[%s1196_s19 + $0xb0] sm:$0xff] %v368_v29  ;;  %v392_v30 = vpop.f32.mrf.mxu3  ;;  %v433_v31 = vpop.f32.mrf.mxu2 }
 0x101   : > { %506 = vst [vmem:[%s1196_s19 + $0x170] sm:$0xff] %v392_v30 }
 0x102   : > { %483 = vst [vmem:[%s1196_s19 + $0xb8] sm:$0xff] %v433_v31 }
 0x106   : > { %v306_v32 = vpop.f32.mrf.mxu0  ;;  %v371_v33 = vpop.f32.mrf.mxu1 }
 0x107   : > { %484 = vst [vmem:[%s1196_s19 + $0xc0] sm:$0xff] %v306_v32 }
 0x108   : > { %485 = vst [vmem:[%s1196_s19 + $0xc8] sm:$0xff] %v371_v33  ;;  %v436_v34 = vpop.f32.mrf.mxu2  ;;  %v448_v35 = vpop.f32.mrf.mxu3 }
 0x109   : > { %486 = vst [vmem:[%s1196_s19 + $0xd0] sm:$0xff] %v436_v34 }
 0x10a   : > { %498 = vst [vmem:[%s1196_s19 + $0x130] sm:$0xff] %v448_v35 }
 0x10e   : > { %v309_v36 = vpop.f32.mrf.mxu0  ;;  %v374_v37 = vpop.f32.mrf.mxu1 }
 0x10f   : > { %487 = vst [vmem:[%s1196_s19 + $0xd8] sm:$0xff] %v309_v36 }
 0x110   : > { %488 = vst [vmem:[%s1196_s19 + $0xe0] sm:$0xff] %v374_v37  ;;  %v439_v38 = vpop.f32.mrf.mxu2  ;;  %v451_v39 = vpop.f32.mrf.mxu3 }
 0x111   : > { %489 = vst [vmem:[%s1196_s19 + $0xe8] sm:$0xff] %v439_v38 }
 0x112   : > { %501 = vst [vmem:[%s1196_s19 + $0x148] sm:$0xff] %v451_v39 }
 0x116   : > { %v312_v40 = vpop.f32.mrf.mxu0  ;;  %v377_v41 = vpop.f32.mrf.mxu1 }
 0x117   : > { %490 = vst [vmem:[%s1196_s19 + $0xf0] sm:$0xff] %v312_v40 }
 0x118   : > { %491 = vst [vmem:[%s1196_s19 + $0xf8] sm:$0xff] %v377_v41  ;;  %v442_v42 = vpop.f32.mrf.mxu2  ;;  %v454_v43 = vpop.f32.mrf.mxu3 }
 0x119   : > { %492 = vst [vmem:[%s1196_s19 + $0x100] sm:$0xff] %v442_v42 }
 0x11a   : > { %504 = vst [vmem:[%s1196_s19 + $0x160] sm:$0xff] %v454_v43 }
 0x11e   : > { %v315_v44 = vpop.f32.mrf.mxu0  ;;  %v380_v45 = vpop.f32.mrf.mxu1 }
 0x11f   : > { %493 = vst [vmem:[%s1196_s19 + $0x108] sm:$0xff] %v315_v44 }
 0x120   : > { %494 = vst [vmem:[%s1196_s19 + $0x110] sm:$0xff] %v380_v45  ;;  %v445_v46 = vpop.f32.mrf.mxu2  ;;  %v457_v47 = vpop.f32.mrf.mxu3 }
 0x121   : > { %495 = vst [vmem:[%s1196_s19 + $0x118] sm:$0xff] %v445_v46 }
 0x122   : > { %507 = vst [vmem:[%s1196_s19 + $0x178] sm:$0xff] %v457_v47 }
 0x123   : > { %855 = shalt.err (!%p852_p0)
}
 0x124   : > { %s921_s30 = smov 384   ;;  %s922_s7 = smov 24  }
 0x125   : > { %695 = dma.vmem_to_hbm [thread:$0]  (%p1017_p5), %s525_s21, 6144, %s527_s22, %s509_s12, %s921_s30, %s921_s30, %s922_s7  }
 0x126 PF: > { %s541_s15 = sand.u32 1, %s894_s9   ;;  %p706_p3 = pnand %p628_p11, %p987_p6 }
 0x127   : > { %s542_s17 = scalar_lea.sflag [#allocation4], %s541_s15 }
 0x128   : > { %p707_p7 = pneg %p706_p3 }
 0x12a   : > { %889 = dma.done.wait (%p707_p7), %s542_s17, 6144  }
 0x12b   : > { %891 = vsyncadd (%p707_p7), %s542_s17, 4294961152  ;;  %s19_s14 = sadd.s32 1, %s914_s14   ;;  %s1295_s9 = smov %s898_s10 }
 0x12c   : > { %p16_p9 = scmp.ge.s32.totalorder %s19_s14, 4   ;;  %s1296_s10 = smov %s902_s11 }
 0x12d   : > { %s1297_s11 = smov %s1026_s8  ;;  %s1298_s12 = smov %s910_s13 }
 0x12e   : > { %s1299_s13 = smov %s1301_s29  ;;  %18 = sbr.rel (!%p16_p9) target bundleno = 7 (0x7), region = 77 }
 0x133   :  { %548 = vsyncpa [#allocation3], 1 }
 0x134   :  { %550 = vsyncpa [#allocation3 + $0x1], 1 }
 0x135   :  { %551 = vsyncpa [#allocation6], 1 }
 0x136   :  { %552 = vsyncpa [#allocation4], 1 }
 0x137   :  { %554 = vsyncpa [#allocation4 + $0x1], 1 }

</bundles_post_ra>
